<compile_context>
chip_gen: v6e
topology: v6e:2x2x1
jax: 0.10.0
libtpu: 0.0.40
codegen_flags: <defaults>
</compile_context>

<pallas_src>
import functools

import jax
import jax.numpy as jnp
from jax.experimental import pallas as pl
from jax.experimental.pallas import tpu as pltpu

# ---------------- config (small, consistent with the module) ----------------
INPUT_DIM = 32    # config.input_dim  (obs feature size)
HIDDEN_DIM = 32   # config.hidden_dim (deterministic recurrent state)
ACTION_DIM = 8    # config.action_dim
STOCH_DIM = 32    # stochastic latent size produced by Encoder / DynamicPredictor
MLP_DIM = 32      # hidden width of Encoder / DynamicPredictor MLPs
MIN_STD = 0.1
ACT_PAD = 32      # action zero-padded to 32 lanes

IN_W = 128        # packed per-step input lanes:  [obs | act_pad | eps_e | eps_d]
OUT_W = 256       # packed per-step output lanes: [z_t|z|h|e_mean|e_std|d_mean|d_std|pad]

# weight slab group indices (slab shape (6, 64, 128), zero padded per group)
W_GRU, W_ENC1, W_PRE, W_ENC2, W_DYN1, W_DYN2 = range(6)
# bias slab row indices (slab shape (8, 128), zero padded per row)
B_GRU, B_ENC2, B_DYN2, B_B1, B_BP, B_BD1 = range(6)


def _softplus(x):
    return jnp.logaddexp(x, 0.0)


# ----------------------------- Pallas kernel --------------------------------
def rssm_step_kernel(xin_ref, h0_ref, w_ref, b_ref, out_ref, h_scr):
    t = pl.program_id(1)

    @pl.when(t == 0)
    def _():
        h_scr[...] = h0_ref[...]          # (re)load initial hidden per batch block

    xin = xin_ref[...]                    # (B_BLK, 128) one full-vreg-wide load
    obs = xin[:, 0:32]
    act = xin[:, 32:64]                   # zero-padded action
    eps_e = xin[:, 64:96]
    eps_d = xin[:, 96:128]
    h = h_scr[...]                        # carried recurrent state

    def mm(x, w):
        return jnp.dot(x, w, preferred_element_type=jnp.float32)

    # ---- Encoder: cat([obs, h]) -> z, (mean, std) ----
    x_oh = jnp.concatenate([obs, h], axis=-1)                        # (B, 64)
    e1 = jnp.tanh(mm(x_oh, w_ref[W_ENC1])[:, 0:32]
                  + b_ref[B_B1:B_B1 + 1, 0:32])
    eh = mm(e1, w_ref[W_ENC2][0:32, :]) + b_ref[B_ENC2:B_ENC2 + 1, :]  # [mean|std|0|0]
    e_mean = eh[:, 0:32]
    e_std = _softplus(eh[:, 32:64]) + MIN_STD
    z = e_mean + e_std * eps_e                                        # dist.rsample()

    # ---- RecurrentModel: fused pre-layer + fully fused GRU cell ----
    z_a = jnp.concatenate([z, act], axis=-1)                          # (B, 64)
    pre = jnp.tanh(mm(z_a, w_ref[W_PRE])[:, 0:32]
                   + b_ref[B_BP:B_BP + 1, 0:32])
    ph = jnp.concatenate([pre, h], axis=-1)                           # (B, 64)
    g = mm(ph, w_ref[W_GRU]) + b_ref[B_GRU:B_GRU + 1, :]              # (B, 128) all gates
    r = jax.nn.sigmoid(g[:, 0:32])
    u = jax.nn.sigmoid(g[:, 32:64])
    n = jnp.tanh(g[:, 64:96] + r * g[:, 96:128])
    h_new = (1.0 - u) * n + u * h

    # ---- DynamicPredictor: h_new -> (mean, std), z_t ----
    d1 = jnp.tanh(mm(h_new, w_ref[W_DYN1][0:32, :])[:, 0:32]
                  + b_ref[B_BD1:B_BD1 + 1, 0:32])
    dh = mm(d1, w_ref[W_DYN2][0:32, :]) + b_ref[B_DYN2:B_DYN2 + 1, :]
    d_mean = dh[:, 0:32]
    d_std = _softplus(dh[:, 32:64]) + MIN_STD
    z_t = d_mean + d_std * eps_d                                      # dynamic_dist.rsample()

    h_scr[...] = h_new                    # carry state to the next time step

    # single lane-dense (B, 256) store (two full vregs, unmasked)
    out_ref[...] = jnp.concatenate(
        [z_t, z, h_new, e_mean, e_std, d_mean, d_std, jnp.zeros_like(z_t)],
        axis=-1)


# ------------------------------- wrappers ------------------------------------
@functools.partial(jax.jit, static_argnames=("b_blk",))
def rssm_rollout(obs_seq, hidden0, action_seq, eps_e_seq, eps_d_seq,
                 w_slab, b_slab, b_blk=16):
    """T-step rollout = the module's forward applied T times with hidden threaded."""
    T, B, _ = obs_seq.shape
    assert obs_seq.shape[2] == INPUT_DIM
    assert hidden0.shape == (B, HIDDEN_DIM)
    assert action_seq.shape[2] == ACTION_DIM
    assert B % b_blk == 0 and b_blk % 8 == 0

    # Wrapper-side layout plumbing (fuses into the surrounding XLA graph).
    act_pad = jnp.pad(action_seq, ((0, 0), (0, 0), (0, ACT_PAD - ACTION_DIM)))
    xin = jnp.concatenate([obs_seq, act_pad, eps_e_seq, eps_d_seq], axis=-1)  # (T,B,128)

    grid = (B // b_blk, T)   # batch blocks "parallel", time "arbitrary" (recurrence)
    out = pl.pallas_call(
        rssm_step_kernel,
        out_shape=jax.ShapeDtypeStruct((T, B, OUT_W), jnp.float32),
        grid_spec=pltpu.PrefetchScalarGridSpec(
            num_scalar_prefetch=0,
            grid=grid,
            in_specs=[
                # per-step streamed inputs
                pl.BlockSpec((None, b_blk, IN_W), lambda b, t: (t, b, 0)),
                # initial hidden: changes only with the batch block
                pl.BlockSpec((b_blk, HIDDEN_DIM), lambda b, t: (b, 0)),
                # weights + biases resident (constant block index => no re-DMA)
                pl.BlockSpec((6, 64, 128), lambda b, t: (0, 0, 0)),
                pl.BlockSpec((8, 128), lambda b, t: (0, 0)),
            ],
            out_specs=pl.BlockSpec((None, b_blk, OUT_W), lambda b, t: (t, b, 0)),
            scratch_shapes=[pltpu.VMEM((b_blk, HIDDEN_DIM), jnp.float32)],
        ),
        compiler_params=pltpu.CompilerParams(
            dimension_semantics=("parallel", "arbitrary")),
    )(xin, hidden0, w_slab, b_slab)

    z_t = out[..., 0:32]
    z = out[..., 32:64]
    h = out[..., 64:96]
    e_mean = out[..., 96:128]
    e_std = out[..., 128:160]
    d_mean = out[..., 160:192]
    d_std = out[..., 192:224]
    return z_t, z, h, e_mean, e_std, d_mean, d_std


def rssm_forward(obs, hidden, action, eps_e, eps_d, w_slab, b_slab, b_blk=16):
    """Exact single-step module forward (T == 1)."""
    assert obs.shape[1] == INPUT_DIM
    assert hidden.shape[1] == HIDDEN_DIM
    assert action.shape[1] == ACTION_DIM
    outs = rssm_rollout(obs[None], hidden, action[None], eps_e[None], eps_d[None],
                        w_slab, b_slab, b_blk=b_blk)
    return tuple(o[0] for o in outs)


# --------------------------- parameter packing --------------------------------
def pack_params(params):
    (w1o, w1h, b1, w2m, w2s, b2m, b2s,
     wpz, wpa, bp,
     wir, wiu, win, whr, whu, whn,
     bir, biu, bin_, bhr, bhu, bhn,
     wd1, bd1, wd2m, wd2s, bd2m, bd2s) = params

    z32 = jnp.zeros((32, 32), jnp.float32)

    # fused GRU weight: g = cat([pre, h]) @ W_gru -> [r | u | n_pre | n_h]
    w_gru = jnp.concatenate([
        jnp.concatenate([wir, wiu, win, z32], axis=1),
        jnp.concatenate([whr, whu, z32, whn], axis=1)], axis=0)       # (64, 128)

    w_enc1 = jnp.concatenate([w1o, w1h], axis=0)                      # (64, 32)
    wpa_pad = jnp.pad(wpa, ((0, ACT_PAD - ACTION_DIM), (0, 0)))       # (32, 32)
    w_pre = jnp.concatenate([wpz, wpa_pad], axis=0)                   # (64, 32)
    w_enc2 = jnp.concatenate([w2m, w2s], axis=1)                      # (32, 64)
    w_dyn2 = jnp.concatenate([wd2m, wd2s], axis=1)                    # (32, 64)

    def pad_group(w):
        r, c = w.shape
        return jnp.pad(w, ((0, 64 - r), (0, 128 - c)))

    w_slab = jnp.stack([w_gru, pad_group(w_enc1), pad_group(w_pre),
                        pad_group(w_enc2), pad_group(wd1), pad_group(w_dyn2)],
                       axis=0)                                        # (6, 64, 128)

    def pad_bias(b):
        return jnp.pad(b, ((0, 0), (0, 128 - b.shape[1])))

    b_slab = jnp.concatenate([
        jnp.concatenate([bir + bhr, biu + bhu, bin_, bhn], axis=1),   # row 0: GRU
        pad_bias(jnp.concatenate([b2m, b2s], axis=1)),                # row 1: enc heads
        pad_bias(jnp.concatenate([bd2m, bd2s], axis=1)),              # row 2: dyn heads
        pad_bias(b1), pad_bias(bp), pad_bias(bd1),                    # rows 3-5
        jnp.zeros((2, 128), jnp.float32),                             # rows 6-7 pad
    ], axis=0)                                                        # (8, 128)
    return w_slab, b_slab


# --------------------------- deterministic init -------------------------------
def init_params(key):
    ks = iter(jax.random.split(key, 40))

    def w(fan_in, fan_out):
        s = 1.0 / float(fan_in) ** 0.5
        return jax.random.uniform(next(ks), (fan_in, fan_out), jnp.float32, -s, s)

    def b(n):
        s = 0.01
        return jax.random.uniform(next(ks), (1, n), jnp.float32, -s, s)

    return [
        # encoder
        w(INPUT_DIM, MLP_DIM), w(HIDDEN_DIM, MLP_DIM), b(MLP_DIM),
        w(MLP_DIM, STOCH_DIM), w(MLP_DIM, STOCH_DIM), b(STOCH_DIM), b(STOCH_DIM),
        # recurrent pre-layer
        w(STOCH_DIM, HIDDEN_DIM), w(ACTION_DIM, HIDDEN_DIM), b(HIDDEN_DIM),
        # GRU weights
        w(HIDDEN_DIM, HIDDEN_DIM), w(HIDDEN_DIM, HIDDEN_DIM), w(HIDDEN_DIM, HIDDEN_DIM),
        w(HIDDEN_DIM, HIDDEN_DIM), w(HIDDEN_DIM, HIDDEN_DIM), w(HIDDEN_DIM, HIDDEN_DIM),
        # GRU biases
        b(HIDDEN_DIM), b(HIDDEN_DIM), b(HIDDEN_DIM),
        b(HIDDEN_DIM), b(HIDDEN_DIM), b(HIDDEN_DIM),
        # dynamic predictor
        w(HIDDEN_DIM, MLP_DIM), b(MLP_DIM),
        w(MLP_DIM, STOCH_DIM), w(MLP_DIM, STOCH_DIM), b(STOCH_DIM), b(STOCH_DIM),
    ]


# --------------------------- pure-JAX reference --------------------------------
def rssm_reference_step(obs, h, act, eps_e, eps_d, params):
    (w1o, w1h, b1, w2m, w2s, b2m, b2s,
     wpz, wpa, bp,
     wir, wiu, win, whr, whu, whn,
     bir, biu, bin_, bhr, bhu, bhn,
     wd1, bd1, wd2m, wd2s, bd2m, bd2s) = params

    e1 = jnp.tanh(obs @ w1o + h @ w1h + b1)
    e_mean = e1 @ w2m + b2m
    e_std = jax.nn.softplus(e1 @ w2s + b2s) + MIN_STD
    z = e_mean + e_std * eps_e

    pre = jnp.tanh(z @ wpz + act @ wpa + bp)
    r = jax.nn.sigmoid(pre @ wir + bir + h @ whr + bhr)
    u = jax.nn.sigmoid(pre @ wiu + biu + h @ whu + bhu)
    n = jnp.tanh(pre @ win + bin_ + r * (h @ whn + bhn))
    h_new = (1.0 - u) * n + u * h

    d1 = jnp.tanh(h_new @ wd1 + bd1)
    d_mean = d1 @ wd2m + bd2m
    d_std = jax.nn.softplus(d1 @ wd2s + bd2s) + MIN_STD
    z_t = d_mean + d_std * eps_d
    return z_t, z, h_new, e_mean, e_std, d_mean, d_std


def rssm_reference_rollout(obs_seq, h0, act_seq, eps_e_seq, eps_d_seq, params):
    h = h0
    outs = []
    for t in range(obs_seq.shape[0]):
        z_t, z, h, e_mean, e_std, d_mean, d_std = rssm_reference_step(
            obs_seq[t], h, act_seq[t], eps_e_seq[t], eps_d_seq[t], params)
        outs.append((z_t, z, h, e_mean, e_std, d_mean, d_std))
    return tuple(jnp.stack(x) for x in zip(*outs))


if __name__ == "__main__":
    key = jax.random.PRNGKey(0)
    kp, ko, kh, ka, ke1, ke2 = jax.random.split(key, 6)
    params = init_params(kp)
    w_slab, b_slab = pack_params(params)

    T, B = 8, 32        # small demo; design scales to B~128-256, long T rollouts
    obs_seq = jax.random.normal(ko, (T, B, INPUT_DIM), jnp.float32)
    hidden0 = jax.random.normal(kh, (B, HIDDEN_DIM), jnp.float32)
    action_seq = jax.random.normal(ka, (T, B, ACTION_DIM), jnp.float32)
    # TODO(synk): torch dist.rsample() draws RNG internally; noise is an explicit input here.
    eps_e_seq = jax.random.normal(ke1, (T, B, STOCH_DIM), jnp.float32)
    eps_d_seq = jax.random.normal(ke2, (T, B, STOCH_DIM), jnp.float32)

    outs = rssm_rollout(obs_seq, hidden0, action_seq, eps_e_seq, eps_d_seq,
                        w_slab, b_slab, b_blk=16)
    outs = jax.block_until_ready(outs)

    refs = rssm_reference_rollout(obs_seq, hidden0, action_seq,
                                  eps_e_seq, eps_d_seq, params)

    names = ["z_t", "z", "h", "enc_mean", "enc_std", "dyn_mean", "dyn_std"]
    for name, o, r in zip(names, outs, refs):
        assert o.shape == r.shape and o.dtype == r.dtype, name
        err = float(jnp.max(jnp.abs(o - r)))
        assert jnp.allclose(o, r, atol=5e-4, rtol=5e-4), f"mismatch in {name}: {err}"

    # exact single-step module forward (T == 1 path)
    step = rssm_forward(obs_seq[0], hidden0, action_seq[0],
                        eps_e_seq[0], eps_d_seq[0], w_slab, b_slab, b_blk=16)
    step = jax.block_until_ready(step)
    step_ref = rssm_reference_step(obs_seq[0], hidden0, action_seq[0],
                                   eps_e_seq[0], eps_d_seq[0], params)
    for name, o, r in zip(names, step, step_ref):
        assert jnp.allclose(o, r, atol=5e-4, rtol=5e-4), f"step mismatch in {name}"

    print("KERNEL_OK")
</pallas_src>

<mosaic_0001>
module attributes {stable_mosaic.version = 11 : i64} {
  func.func @rssm_step_kernel(%arg0: i32, %arg1: i32, %arg2: memref<1x16x128xf32, #tpu.memory_space<vmem>>, %arg3: memref<16x32xf32, #tpu.memory_space<vmem>>, %arg4: memref<6x64x128xf32, #tpu.memory_space<vmem>>, %arg5: memref<8x128xf32, #tpu.memory_space<vmem>>, %arg6: memref<1x16x256xf32, #tpu.memory_space<vmem>>, %arg7: memref<16x32xf32, #tpu.memory_space<vmem>>) attributes {dimension_semantics = [#tpu.dimension_semantics<parallel>, #tpu.dimension_semantics<arbitrary>], iteration_bounds = array<i64: 2, 8>, scalar_prefetch = 0 : i64, scratch_operands = 1 : i64, tpu.core_type = #tpu.core_type<tc>, window_params = [{transform_indices = @transform_0, window_bounds = array<i64: 1, 16, 128>}, {transform_indices = @transform_1, window_bounds = array<i64: 16, 32>}, {pipeline_mode = #tpu.pipeline_mode<synchronous>, transform_indices = @transform_2, window_bounds = array<i64: 6, 64, 128>}, {pipeline_mode = #tpu.pipeline_mode<synchronous>, transform_indices = @transform_3, window_bounds = array<i64: 8, 128>}, {transform_indices = @transform_4, window_bounds = array<i64: 1, 16, 256>}]} {
    %c0_i32 = arith.constant 0 : i32
    %0 = arith.cmpi eq, %arg1, %c0_i32 : i32
    %1 = arith.extui %0 : i1 to i32
    %c0_i32_0 = arith.constant 0 : i32
    %2 = arith.cmpi ne, %1, %c0_i32_0 : i32
    scf.if %2 {
      %c0_50 = arith.constant 0 : index
      %c0_51 = arith.constant 0 : index
      %126 = vector.load %arg3[%c0_50, %c0_51] : memref<16x32xf32, #tpu.memory_space<vmem>>, vector<16x32xf32>
      %c0_52 = arith.constant 0 : index
      %c0_53 = arith.constant 0 : index
      %127 = vector.load %arg7[%c0_52, %c0_53] : memref<16x32xf32, #tpu.memory_space<vmem>>, vector<16x32xf32>
      tpu.vector_store %arg7[%c0_52, %c0_53], %126 {strides = array<i32>} : memref<16x32xf32, #tpu.memory_space<vmem>>, vector<16x32xf32>,
    } else {
    }
    %c0 = arith.constant 0 : index
    %c0_1 = arith.constant 0 : index
    %c0_2 = arith.constant 0 : index
    %3 = vector.load %arg2[%c0, %c0_1, %c0_2] : memref<1x16x128xf32, #tpu.memory_space<vmem>>, vector<1x16x128xf32>
    %4 = vector.shape_cast %3 : vector<1x16x128xf32> to vector<16x128xf32>
    %5 = vector.extract_strided_slice %4 {offsets = [0, 0], sizes = [16, 32], strides = [1, 1]} : vector<16x128xf32> to vector<16x32xf32>
    %6 = vector.extract_strided_slice %4 {offsets = [0, 32], sizes = [16, 32], strides = [1, 1]} : vector<16x128xf32> to vector<16x32xf32>
    %7 = vector.extract_strided_slice %4 {offsets = [0, 64], sizes = [16, 32], strides = [1, 1]} : vector<16x128xf32> to vector<16x32xf32>
    %8 = vector.extract_strided_slice %4 {offsets = [0, 96], sizes = [16, 32], strides = [1, 1]} : vector<16x128xf32> to vector<16x32xf32>
    %c0_3 = arith.constant 0 : index
    %c0_4 = arith.constant 0 : index
    %9 = vector.load %arg7[%c0_3, %c0_4] : memref<16x32xf32, #tpu.memory_space<vmem>>, vector<16x32xf32>
    %10 = tpu.concatenate %5, %9 in 1 : vector<16x32xf32>, vector<16x32xf32> -> vector<16x64xf32>
    %c1 = arith.constant 1 : index
    %c0_5 = arith.constant 0 : index
    %c0_6 = arith.constant 0 : index
    %11 = vector.load %arg4[%c1, %c0_5, %c0_6] : memref<6x64x128xf32, #tpu.memory_space<vmem>>, vector<1x64x128xf32>
    %12 = vector.shape_cast %11 : vector<1x64x128xf32> to vector<64x128xf32>
    %cst = arith.constant dense<0.000000e+00> : vector<16x128xf32>
    %13 = tpu.matmul %10, %12, %cst {dimension_numbers = #tpu.dot_dimension_numbers<[1], [0], [0], [1], [0, 0, 1, 1], [], []>} : vector<16x64xf32>, vector<64x128xf32>, vector<16x128xf32> -> vector<16x128xf32>
    %14 = vector.extract_strided_slice %13 {offsets = [0, 0], sizes = [16, 32], strides = [1, 1]} : vector<16x128xf32> to vector<16x32xf32>
    %c3 = arith.constant 3 : index
    %c0_7 = arith.constant 0 : index
    %15 = vector.load %arg5[%c3, %c0_7] : memref<8x128xf32, #tpu.memory_space<vmem>>, vector<1x32xf32>
    %16 = vector.broadcast %15 : vector<1x32xf32> to vector<16x32xf32>
    %17 = arith.addf %14, %16 : vector<16x32xf32>
    %18 = math.tanh %17 : vector<16x32xf32>
    %c3_8 = arith.constant 3 : index
    %c0_9 = arith.constant 0 : index
    %c0_10 = arith.constant 0 : index
    %19 = vector.load %arg4[%c3_8, %c0_9, %c0_10] : memref<6x64x128xf32, #tpu.memory_space<vmem>>, vector<1x64x128xf32>
    %20 = vector.shape_cast %19 : vector<1x64x128xf32> to vector<64x128xf32>
    %21 = vector.extract_strided_slice %20 {offsets = [0, 0], sizes = [32, 128], strides = [1, 1]} : vector<64x128xf32> to vector<32x128xf32>
    %cst_11 = arith.constant dense<0.000000e+00> : vector<16x128xf32>
    %22 = tpu.matmul %18, %21, %cst_11 {dimension_numbers = #tpu.dot_dimension_numbers<[1], [0], [0], [1], [0, 0, 1, 1], [], []>} : vector<16x32xf32>, vector<32x128xf32>, vector<16x128xf32> -> vector<16x128xf32>
    %c1_12 = arith.constant 1 : index
    %c0_13 = arith.constant 0 : index
    %23 = vector.load %arg5[%c1_12, %c0_13] : memref<8x128xf32, #tpu.memory_space<vmem>>, vector<1x128xf32>
    %24 = vector.broadcast %23 : vector<1x128xf32> to vector<16x128xf32>
    %25 = arith.addf %22, %24 : vector<16x128xf32>
    %26 = vector.extract_strided_slice %25 {offsets = [0, 0], sizes = [16, 32], strides = [1, 1]} : vector<16x128xf32> to vector<16x32xf32>
    %27 = vector.extract_strided_slice %25 {offsets = [0, 32], sizes = [16, 32], strides = [1, 1]} : vector<16x128xf32> to vector<16x32xf32>
    %cst_14 = arith.constant 0.000000e+00 : f32
    %28 = vector.broadcast %cst_14 : f32 to vector<16x32xf32>
    %29 = arith.maximumf %27, %28 : vector<16x32xf32>
    %30 = vector.broadcast %cst_14 : f32 to vector<16x32xf32>
    %31 = arith.subf %27, %30 : vector<16x32xf32>
    %32 = arith.cmpf one, %31, %31 : vector<16x32xf32>
    %33 = vector.broadcast %cst_14 : f32 to vector<16x32xf32>
    %34 = arith.addf %27, %33 : vector<16x32xf32>
    %35 = math.absf %31 : vector<16x32xf32>
    %cst_15 = arith.constant 0.000000e+00 : f32
    %36 = vector.broadcast %cst_15 : f32 to vector<16x32xf32>
    %37 = arith.subf %36, %35 : vector<16x32xf32>
    %38 = math.exp %37 : vector<16x32xf32>
    %39 = math.log1p %38 : vector<16x32xf32>
    %40 = arith.addf %29, %39 : vector<16x32xf32>
    %41 = arith.select %32, %34, %40 : vector<16x32xi1>, vector<16x32xf32>
    %cst_16 = arith.constant 1.000000e-01 : f32
    %42 = vector.broadcast %cst_16 : f32 to vector<16x32xf32>
    %43 = arith.addf %41, %42 : vector<16x32xf32>
    %44 = arith.mulf %43, %7 : vector<16x32xf32>
    %45 = arith.addf %26, %44 : vector<16x32xf32>
    %46 = tpu.concatenate %45, %6 in 1 : vector<16x32xf32>, vector<16x32xf32> -> vector<16x64xf32>
    %c2 = arith.constant 2 : index
    %c0_17 = arith.constant 0 : index
    %c0_18 = arith.constant 0 : index
    %47 = vector.load %arg4[%c2, %c0_17, %c0_18] : memref<6x64x128xf32, #tpu.memory_space<vmem>>, vector<1x64x128xf32>
    %48 = vector.shape_cast %47 : vector<1x64x128xf32> to vector<64x128xf32>
    %cst_19 = arith.constant dense<0.000000e+00> : vector<16x128xf32>
    %49 = tpu.matmul %46, %48, %cst_19 {dimension_numbers = #tpu.dot_dimension_numbers<[1], [0], [0], [1], [0, 0, 1, 1], [], []>} : vector<16x64xf32>, vector<64x128xf32>, vector<16x128xf32> -> vector<16x128xf32>
    %50 = vector.extract_strided_slice %49 {offsets = [0, 0], sizes = [16, 32], strides = [1, 1]} : vector<16x128xf32> to vector<16x32xf32>
    %c4 = arith.constant 4 : index
    %c0_20 = arith.constant 0 : index
    %51 = vector.load %arg5[%c4, %c0_20] : memref<8x128xf32, #tpu.memory_space<vmem>>, vector<1x32xf32>
    %52 = vector.broadcast %51 : vector<1x32xf32> to vector<16x32xf32>
    %53 = arith.addf %50, %52 : vector<16x32xf32>
    %54 = math.tanh %53 : vector<16x32xf32>
    %55 = tpu.concatenate %54, %9 in 1 : vector<16x32xf32>, vector<16x32xf32> -> vector<16x64xf32>
    %c0_21 = arith.constant 0 : index
    %c0_22 = arith.constant 0 : index
    %c0_23 = arith.constant 0 : index
    %56 = vector.load %arg4[%c0_21, %c0_22, %c0_23] : memref<6x64x128xf32, #tpu.memory_space<vmem>>, vector<1x64x128xf32>
    %57 = vector.shape_cast %56 : vector<1x64x128xf32> to vector<64x128xf32>
    %cst_24 = arith.constant dense<0.000000e+00> : vector<16x128xf32>
    %58 = tpu.matmul %55, %57, %cst_24 {dimension_numbers = #tpu.dot_dimension_numbers<[1], [0], [0], [1], [0, 0, 1, 1], [], []>} : vector<16x64xf32>, vector<64x128xf32>, vector<16x128xf32> -> vector<16x128xf32>
    %c0_25 = arith.constant 0 : index
    %c0_26 = arith.constant 0 : index
    %59 = vector.load %arg5[%c0_25, %c0_26] : memref<8x128xf32, #tpu.memory_space<vmem>>, vector<1x128xf32>
    %60 = vector.broadcast %59 : vector<1x128xf32> to vector<16x128xf32>
    %61 = arith.addf %58, %60 : vector<16x128xf32>
    %62 = vector.extract_strided_slice %61 {offsets = [0, 0], sizes = [16, 32], strides = [1, 1]} : vector<16x128xf32> to vector<16x32xf32>
    %63 = arith.negf %62 : vector<16x32xf32>
    %64 = math.exp %63 : vector<16x32xf32>
    %cst_27 = arith.constant 1.000000e+00 : f32
    %65 = vector.broadcast %cst_27 : f32 to vector<16x32xf32>
    %66 = arith.addf %65, %64 : vector<16x32xf32>
    %67 = arith.divf %65, %66 : vector<16x32xf32>
    %68 = vector.extract_strided_slice %61 {offsets = [0, 32], sizes = [16, 32], strides = [1, 1]} : vector<16x128xf32> to vector<16x32xf32>
    %69 = arith.negf %68 : vector<16x32xf32>
    %70 = math.exp %69 : vector<16x32xf32>
    %cst_28 = arith.constant 1.000000e+00 : f32
    %71 = vector.broadcast %cst_28 : f32 to vector<16x32xf32>
    %72 = arith.addf %71, %70 : vector<16x32xf32>
    %73 = arith.divf %71, %72 : vector<16x32xf32>
    %74 = vector.extract_strided_slice %61 {offsets = [0, 64], sizes = [16, 32], strides = [1, 1]} : vector<16x128xf32> to vector<16x32xf32>
    %75 = vector.extract_strided_slice %61 {offsets = [0, 96], sizes = [16, 32], strides = [1, 1]} : vector<16x128xf32> to vector<16x32xf32>
    %76 = arith.mulf %67, %75 : vector<16x32xf32>
    %77 = arith.addf %74, %76 : vector<16x32xf32>
    %78 = math.tanh %77 : vector<16x32xf32>
    %cst_29 = arith.constant 1.000000e+00 : f32
    %79 = vector.broadcast %cst_29 : f32 to vector<16x32xf32>
    %80 = arith.subf %79, %73 : vector<16x32xf32>
    %81 = arith.mulf %80, %78 : vector<16x32xf32>
    %82 = arith.mulf %73, %9 : vector<16x32xf32>
    %83 = arith.addf %81, %82 : vector<16x32xf32>
    %c4_30 = arith.constant 4 : index
    %c0_31 = arith.constant 0 : index
    %c0_32 = arith.constant 0 : index
    %84 = vector.load %arg4[%c4_30, %c0_31, %c0_32] : memref<6x64x128xf32, #tpu.memory_space<vmem>>, vector<1x64x128xf32>
    %85 = vector.shape_cast %84 : vector<1x64x128xf32> to vector<64x128xf32>
    %86 = vector.extract_strided_slice %85 {offsets = [0, 0], sizes = [32, 128], strides = [1, 1]} : vector<64x128xf32> to vector<32x128xf32>
    %cst_33 = arith.constant dense<0.000000e+00> : vector<16x128xf32>
    %87 = tpu.matmul %83, %86, %cst_33 {dimension_numbers = #tpu.dot_dimension_numbers<[1], [0], [0], [1], [0, 0, 1, 1], [], []>} : vector<16x32xf32>, vector<32x128xf32>, vector<16x128xf32> -> vector<16x128xf32>
    %88 = vector.extract_strided_slice %87 {offsets = [0, 0], sizes = [16, 32], strides = [1, 1]} : vector<16x128xf32> to vector<16x32xf32>
    %c5 = arith.constant 5 : index
    %c0_34 = arith.constant 0 : index
    %89 = vector.load %arg5[%c5, %c0_34] : memref<8x128xf32, #tpu.memory_space<vmem>>, vector<1x32xf32>
    %90 = vector.broadcast %89 : vector<1x32xf32> to vector<16x32xf32>
    %91 = arith.addf %88, %90 : vector<16x32xf32>
    %92 = math.tanh %91 : vector<16x32xf32>
    %c5_35 = arith.constant 5 : index
    %c0_36 = arith.constant 0 : index
    %c0_37 = arith.constant 0 : index
    %93 = vector.load %arg4[%c5_35, %c0_36, %c0_37] : memref<6x64x128xf32, #tpu.memory_space<vmem>>, vector<1x64x128xf32>
    %94 = vector.shape_cast %93 : vector<1x64x128xf32> to vector<64x128xf32>
    %95 = vector.extract_strided_slice %94 {offsets = [0, 0], sizes = [32, 128], strides = [1, 1]} : vector<64x128xf32> to vector<32x128xf32>
    %cst_38 = arith.constant dense<0.000000e+00> : vector<16x128xf32>
    %96 = tpu.matmul %92, %95, %cst_38 {dimension_numbers = #tpu.dot_dimension_numbers<[1], [0], [0], [1], [0, 0, 1, 1], [], []>} : vector<16x32xf32>, vector<32x128xf32>, vector<16x128xf32> -> vector<16x128xf32>
    %c2_39 = arith.constant 2 : index
    %c0_40 = arith.constant 0 : index
    %97 = vector.load %arg5[%c2_39, %c0_40] : memref<8x128xf32, #tpu.memory_space<vmem>>, vector<1x128xf32>
    %98 = vector.broadcast %97 : vector<1x128xf32> to vector<16x128xf32>
    %99 = arith.addf %96, %98 : vector<16x128xf32>
    %100 = vector.extract_strided_slice %99 {offsets = [0, 0], sizes = [16, 32], strides = [1, 1]} : vector<16x128xf32> to vector<16x32xf32>
    %101 = vector.extract_strided_slice %99 {offsets = [0, 32], sizes = [16, 32], strides = [1, 1]} : vector<16x128xf32> to vector<16x32xf32>
    %cst_41 = arith.constant 0.000000e+00 : f32
    %102 = vector.broadcast %cst_41 : f32 to vector<16x32xf32>
    %103 = arith.maximumf %101, %102 : vector<16x32xf32>
    %104 = vector.broadcast %cst_41 : f32 to vector<16x32xf32>
    %105 = arith.subf %101, %104 : vector<16x32xf32>
    %106 = arith.cmpf one, %105, %105 : vector<16x32xf32>
    %107 = vector.broadcast %cst_41 : f32 to vector<16x32xf32>
    %108 = arith.addf %101, %107 : vector<16x32xf32>
    %109 = math.absf %105 : vector<16x32xf32>
    %cst_42 = arith.constant 0.000000e+00 : f32
    %110 = vector.broadcast %cst_42 : f32 to vector<16x32xf32>
    %111 = arith.subf %110, %109 : vector<16x32xf32>
    %112 = math.exp %111 : vector<16x32xf32>
    %113 = math.log1p %112 : vector<16x32xf32>
    %114 = arith.addf %103, %113 : vector<16x32xf32>
    %115 = arith.select %106, %108, %114 : vector<16x32xi1>, vector<16x32xf32>
    %cst_43 = arith.constant 1.000000e-01 : f32
    %116 = vector.broadcast %cst_43 : f32 to vector<16x32xf32>
    %117 = arith.addf %115, %116 : vector<16x32xf32>
    %118 = arith.mulf %117, %8 : vector<16x32xf32>
    %119 = arith.addf %100, %118 : vector<16x32xf32>
    %c0_44 = arith.constant 0 : index
    %c0_45 = arith.constant 0 : index
    %120 = vector.load %arg7[%c0_44, %c0_45] : memref<16x32xf32, #tpu.memory_space<vmem>>, vector<16x32xf32>
    tpu.vector_store %arg7[%c0_44, %c0_45], %83 {strides = array<i32>} : memref<16x32xf32, #tpu.memory_space<vmem>>, vector<16x32xf32>,
    %cst_46 = arith.constant 0.000000e+00 : f32
    %121 = vector.broadcast %cst_46 : f32 to vector<16x32xf32>
    %122 = tpu.concatenate %119, %45, %83, %26, %43, %100, %117, %121 in 1 : vector<16x32xf32>, vector<16x32xf32>, vector<16x32xf32>, vector<16x32xf32>, vector<16x32xf32>, vector<16x32xf32>, vector<16x32xf32>, vector<16x32xf32> -> vector<16x256xf32>
    %c0_47 = arith.constant 0 : index
    %c0_48 = arith.constant 0 : index
    %c0_49 = arith.constant 0 : index
    %123 = vector.load %arg6[%c0_47, %c0_48, %c0_49] : memref<1x16x256xf32, #tpu.memory_space<vmem>>, vector<1x16x256xf32>
    %124 = vector.shape_cast %123 : vector<1x16x256xf32> to vector<16x256xf32>
    %125 = vector.shape_cast %122 : vector<16x256xf32> to vector<1x16x256xf32>
    tpu.vector_store %arg6[%c0_47, %c0_48, %c0_49], %125 {strides = array<i32>} : memref<1x16x256xf32, #tpu.memory_space<vmem>>, vector<1x16x256xf32>,
    return
  }
  func.func @transform_0(%arg0: i32, %arg1: i32) -> (i32, i32, i32) {
    %c0_i32 = arith.constant 0 : i32
    %c0_i32_0 = arith.constant 0 : i32
    return %arg1, %arg0, %c0_i32 : i32, i32, i32
  }
  func.func @transform_1(%arg0: i32, %arg1: i32) -> (i32, i32) {
    %c0_i32 = arith.constant 0 : i32
    %c0_i32_0 = arith.constant 0 : i32
    return %arg0, %c0_i32 : i32, i32
  }
  func.func @transform_2(%arg0: i32, %arg1: i32) -> (i32, i32, i32) {
    %c0_i32 = arith.constant 0 : i32
    %c0_i32_0 = arith.constant 0 : i32
    %c0_i32_1 = arith.constant 0 : i32
    %c0_i32_2 = arith.constant 0 : i32
    return %c0_i32, %c0_i32_0, %c0_i32_1 : i32, i32, i32
  }
  func.func @transform_3(%arg0: i32, %arg1: i32) -> (i32, i32) {
    %c0_i32 = arith.constant 0 : i32
    %c0_i32_0 = arith.constant 0 : i32
    %c0_i32_1 = arith.constant 0 : i32
    return %c0_i32, %c0_i32_0 : i32, i32
  }
  func.func @transform_4(%arg0: i32, %arg1: i32) -> (i32, i32, i32) {
    %c0_i32 = arith.constant 0 : i32
    %c0_i32_0 = arith.constant 0 : i32
    return %arg1, %arg0, %c0_i32 : i32, i32, i32
  }
}

</mosaic_0001>

<bundles_post_ra>
// kernel: rssm_rollout.1
= control target key start
LH: loop header
LB: loop body
LE: loop exit
PB: predicated region body
PF: predicated region fallthrough
CT: control target
= control target key end

     0   :  { %s1556_s15 = smov 0   ;;  %s1558_s16 = smov 0   ;;  %s1887_s0 = inlined_call_operand.vmem [shape: f32[8,32,128], index: 0, kind: input, shape index: {}]   ;;  %s1888_s1 = inlined_call_operand.vmem [shape: f32[32,32], index: 1, kind: input, shape index: {}]   ;;  %s1889_s2 = inlined_call_operand.vmem [shape: f32[6,64,128], index: 2, kind: input, shape index: {}]   ;;  %s1890_s3 = inlined_call_operand.vmem [shape: f32[8,128], index: 3, kind: input, shape index: {}]   ;;  %s1891_s4 = inlined_call_operand.vmem [shape: f32[8,32,256], index: 4, kind: output, shape index: {}]  }
   0x1   :  { %s1560_s17 = smov 0   ;;  %s1562_s18 = smov 0  }
   0x2   :  { %s1564_s19 = smov 0  }
   0x3 LB: > { %s23_s20 = sadd.s32 1, %s1518_s17  ;;  %s26_s21 = sadd.s32 1, %s1522_s18  ;;  %s1526_s19 = sphi %s1564_s19, %s14_s19   ;;  %s1522_s18 = sphi %s1562_s18, %s1895_s18   ;;  %s1518_s17 = sphi %s1560_s17, %s1894_s17   ;;  %s1514_s16 = sphi %s1558_s16, %s1893_s16   ;;  %s1510_s15 = sphi %s1556_s15, %s1892_s15  }
   0x4   : > { %p24_p0 = scmp.ge.s32.totalorder %s23_s20, 8  ;;  %p1206_p1 = scmp.ge.s32.totalorder %s1526_s19, 1 }
   0x5   : > { %p194_p2 = scmp.lt.s32.totalorder %s1526_s19, 17 }
   0x6   : > { %s1897_s20 = smov (%p24_p0, %s23_s20), 0  ;;  %s1899_s21 = smov (!%p24_p0, %s26_s21), %s1522_s18 }
   0x7   : > { %p195_p3 = pnand %p1206_p1, %p194_p2  ;;  %p28_p4 = scmp.ge.s32.totalorder %s1899_s21, 2 }
   0x8   : > { %s1207_s22 = sshll.u32 (!%p195_p3), %s1514_s16, 1  ;;  %p235_p5 = scmp.lt.s32.totalorder (!%p195_p3), %s1510_s15, 7 }
   0x9   : > { %s1901_s21 = smov (%p28_p4, %s1899_s21), 0  ;;  %198 = sbr.rel (%p195_p3) target bundleno = 2199 (0x897), region = 36 }
   0xa   : > { %p237_p6 = scmp.lt.s32.totalorder (!%p195_p3), %s1207_s22, 3  ;;  %p1216_p7 = scmp.ne.s32.totalorder (!%p195_p3), %s1510_s15, 0 }
   0xe   : > { %s236_s23 = scalar_select %p235_p5, %s1510_s15, 7 }
   0xf   : > { %s1903_s22 = smov (!%p237_p6, %s1207_s22), 3 }
  0x10   : > { %s1208_s24 = sshll.u32 %s236_s23, 2  ;;  %s1214_s25 = sshll.u32 %s236_s23, 3 }
  0x11   : > { %s240_s26 = sadd.s32 %s1208_s24, %s1903_s22  ;;  %s1211_s27 = sshll.u32 %s1903_s22, 3 }
  0x12   : > { %s1209_s28 = sshll.u32 %s240_s26, 3  ;;  %s248_s5 = scalar_lea.vmem %s1888_s1, %s1211_s27 }
  0x13   : > { %s1596_s8 = scalar_lea.vmem %s1887_s0, %s1209_s28  ;;  %s1213_s9 = sshll.u32 %s1903_s22, 1 }
  0x14   : > { %s257_s10 = sadd.s32 %s1214_s25, %s1213_s9  ;;  %264 = sbr.rel (%p1216_p7) target bundleno = 27 (0x1b), region = 40 }
  0x15   : > { %s1215_s11 = sshll.u32 %s257_s10, 3 }
  0x16   : > { %s1601_s14 = scalar_lea.vmem %s1891_s4, %s1215_s11 }
  0x19   : > { %v265_v0 = vld [vmem:[%s248_s5] sm:$0xff]  ;;  %vm267_vm0 = vcmask 261120   ;;  %v266_v1 = vld [vmem:[%s248_s5 + $0x8] sm:$0xff] }
  0x1a   : > { %268 = vst.msk [vmem:[#allocation2] sm:$0xff] %vm267_vm0, %v265_v0  ;;  %269 = vst.msk [vmem:[#allocation2 + $0x8] sm:$0xff] %vm267_vm0, %v266_v1 }
  0x1b PF: > { %v1224_v3 = vld [vmem:[%s1889_s2 + $0x78] sm:$0xff]  ;;  %s1528_s22 = smov 32   ;;  %v1223_v4 = vld [vmem:[%s1889_s2 + $0x70] sm:$0xff]  ;;  %v1222_v6 = vld [vmem:[%s1889_s2 + $0x68] sm:$0xff]  ;;  %vm282_vm1 = vcmask 261120   ;;  %vm294_vm2 = vcmask 523264  }
  0x1c   : > { %1315 = vmatprep.subr.mxu0 %v1224_v3  ;;  %v1221_v7 = vld [vmem:[%s1889_s2 + $0x60] sm:$0xff]  ;;  %v1220_v8 = vld [vmem:[%s1889_s2 + $0x58] sm:$0xff]  ;;  %v1219_v9 = vld [vmem:[%s1889_s2 + $0x50] sm:$0xff]  ;;  %s1529_s26 = smov 96   ;;  %s1530_s5 = smov 64   ;;  %vm1081_vm11 = vcmask 785408  }
  0x1d   : > { %1316 = vmatpush3.msra.mxu0 %v1224_v3  ;;  %v1218_v10 = vld [vmem:[%s1889_s2 + $0x48] sm:$0xff]  ;;  %v1217_v11 = vld [vmem:[%s1889_s2 + $0x40] sm:$0xff]  ;;  %v1231_v18 = vld [vmem:[%s1889_s2 + $0xd8] sm:$0xff] }
  0x1e   : > { %1317 = vmatprep.subr.mxu0 %v1223_v4  ;;  %v1631_v12 = vld [vmem:[%s1596_s8] sm:$0xff]  ;;  %v1640_v15 = vld [vmem:[%s1596_s8 + $0x8] sm:$0xff]  ;;  %v1230_v19 = vld [vmem:[%s1889_s2 + $0xd0] sm:$0xff]  ;;  %1334 = vmatprep.subr.mxu1 %v1231_v18 }
  0x1f   : > { %1318 = vmatpush3.msra.mxu0 %v1223_v4  ;;  %1335 = vmatpush3.msra.mxu1 %v1231_v18  ;;  %v1229_v20 = vld [vmem:[%s1889_s2 + $0xc8] sm:$0xff]  ;;  %v1228_v21 = vld [vmem:[%s1889_s2 + $0xc0] sm:$0xff]  ;;  %v1242_v29 = vld [vmem:[%s1889_s2 + $0xb8] sm:$0xff] }
  0x20   : > { %1319 = vmatprep.subr.mxu0 %v1222_v6  ;;  %1336 = vmatprep.subr.mxu1 %v1230_v19  ;;  %v1227_v22 = vld [vmem:[%s1890_s3 + $0x3] ss:$0 sm:$0xff]  ;;  %v1241_v30 = vld [vmem:[%s1889_s2 + $0xb0] sm:$0xff]  ;;  %v1240_v31 = vld [vmem:[%s1889_s2 + $0xa8] sm:$0xff] }
  0x21   : > { %v272_v2 = vld [vmem:[#allocation2] sm:$0xff]  ;;  %v273_v5 = vld [vmem:[#allocation2 + $0x8] sm:$0xff]  ;;  %1320 = vmatpush3.msra.mxu0 %v1222_v6  ;;  %1337 = vmatpush3.msra.mxu1 %v1230_v19  ;;  %v1238_v33 = vld [vmem:[%s1889_s2 + $0x98] sm:$0xff] }
  0x22   : > { %276 = vrot.lane.b32.xlu0 %v272_v2, %s1528_s22  ;;  %1321 = vmatprep.subr.mxu0 %v1221_v7  ;;  %v1239_v32 = vld [vmem:[%s1889_s2 + $0xa0] sm:$0xff]  ;;  %v1237_v53 = vld [vmem:[%s1889_s2 + $0x90] sm:$0xff]  ;;  %v1236_v58 = vld [vmem:[%s1889_s2 + $0x88] sm:$0xff] }
  0x23   : > { %1322 = vmatpush3.msra.mxu0 %v1221_v7  ;;  %1338 = vmatprep.subr.mxu1 %v1229_v20  ;;  %v1232_v34 = vld [vmem:[%s1890_s3 + $0x1] ss:$0 sm:$0xff] }
  0x24   : > { %1323 = vmatprep.subr.mxu0 %v1220_v8  ;;  %1339 = vmatpush3.msra.mxu1 %v1229_v20  ;;  %v1235_v59 = vld [vmem:[%s1889_s2 + $0x80] sm:$0xff] }
  0x25   : > { %1324 = vmatpush3.msra.mxu0 %v1220_v8  ;;  %1340 = vmatprep.subr.mxu1 %v1228_v21 }
  0x26   : > { %278 = vrot.lane.b32.xlu0 %v273_v5, %s1528_s22  ;;  %1325 = vmatprep.subr.mxu0 %v1219_v9 }
  0x27   : > { %1326 = vmatpush3.msra.mxu0 %v1219_v9  ;;  %1341 = vmatpush3.msra.mxu1 %v1228_v21 }
  0x28   : > { %1327 = vmatprep.subr.mxu0 %v1218_v10  ;;  %516 = vrot.lane.b32.xlu1 %v1631_v12, %s1529_s26 }
  0x29   : > { %1328 = vmatpush3.msra.mxu0 %v1218_v10  ;;  %1345 = vmatprep.subr.mxu1 %v1242_v29 }
  0x2a   : > { %1329 = vmatprep.subr.mxu0 %v1217_v11 }
  0x2b   : > { %1330 = vmatpush3.msra.mxu0 %v1217_v11 }
  0x2c   : > { %518 = vrot.lane.b32.xlu1 %v1640_v15, %s1529_s26 }
  0x94   : > { %v1633_v13 = vpop.permute.xlu0 %276 }
  0x95   : > { %v283_v14 = vsel %vm282_vm1, %v1631_v12, %v1633_v13 }
  0x96   : > { %1331 = vmatprep.mubr.msk.f32.mxu0 %vm294_vm2, %v283_v14 }
  0x98   : > { %v1642_v16 = vpop.permute.xlu0 %278 }
  0x99   : > { %v284_v17 = vsel %vm282_vm1, %v1640_v15, %v1642_v16 }
  0x9a   : > { %1332 = vmatmul.mubr.msk.f32.vlgmr.msra.gmra.mxu0 %vm294_vm2, %v284_v17  ;;  %v517_v56 = vpop.permute.xlu1 %516 }
  0x9e   : > { %v519_v7 = vpop.permute.xlu1 %518 }
 0x15a   : > { %v1333_v23 = vpop.f32.mrf.mxu0 }
 0x15b   : > { %v382_v24 = vadd.f32 %v1333_v23, %v1227_v22 }
 0x15c   : > { %v367_v25 = vpop.f32.mrf.mxu0 }
 0x15d   : > { %v381_v26 = vadd.f32 %v1227_v22, %v367_v25  ;;  %v643_v25 = vld [vmem:[%s1889_s2 + $0x30] sm:$0xff] }
 0x15f   : > { %1448 = vtanh.f32 %v381_v26  ;;  %v642_v26 = vld [vmem:[%s1889_s2 + $0x28] sm:$0xff] }
 0x160   : > { %1450 = vtanh.f32 %v382_v24  ;;  %v644_v24 = vld [vmem:[%s1889_s2 + $0x38] sm:$0xff] }
 0x161   : > { %1364 = vmatprep.subr.mxu0 %v644_v24 }
 0x162   : > { %1365 = vmatpush3.msra.mxu0 %v644_v24 }
 0x163   : > { %1366 = vmatprep.subr.mxu0 %v643_v25 }
 0x164   : > { %1367 = vmatpush3.msra.mxu0 %v643_v25 }
 0x165   : > { %1368 = vmatprep.subr.mxu0 %v642_v26 }
 0x166   : > { %1369 = vmatpush3.msra.mxu0 %v642_v26 }
 0x16c   : > { %v1449_v27 = vpop.eup %1448 }
 0x16d   : > { %v1451_v28 = vpop.eup %1450  ;;  %1342 = vmatprep.mubr.msk.f32.mxu1 %vm282_vm1, %v1449_v27  ;;  %v641_v27 = vld [vmem:[%s1889_s2 + $0x20] sm:$0xff] }
 0x16e   : > { %1343 = vmatmul.mubr.msk.f32.vlgmr.msra.gmra.mxu1 %vm282_vm1, %v1451_v28  ;;  %v640_v28 = vld [vmem:[%s1889_s2 + $0x18] sm:$0xff]  ;;  %1370 = vmatprep.subr.mxu0 %v641_v27 }
 0x16f   : > { %1346 = vmatpush3.msra.mxu1 %v1242_v29  ;;  %1371 = vmatpush3.msra.mxu0 %v641_v27  ;;  %v639_v29 = vld [vmem:[%s1889_s2 + $0x10] sm:$0xff] }
 0x170   : > { %1347 = vmatprep.subr.mxu1 %v1241_v30  ;;  %1372 = vmatprep.subr.mxu0 %v640_v28 }
 0x171   : > { %1348 = vmatpush3.msra.mxu1 %v1241_v30  ;;  %1373 = vmatpush3.msra.mxu0 %v640_v28  ;;  %v638_v30 = vld [vmem:[%s1889_s2 + $0x8] sm:$0xff] }
 0x172   : > { %1349 = vmatprep.subr.mxu1 %v1240_v31  ;;  %1374 = vmatprep.subr.mxu0 %v639_v29 }
 0x173   : > { %1350 = vmatpush3.msra.mxu1 %v1240_v31  ;;  %1375 = vmatpush3.msra.mxu0 %v639_v29  ;;  %v637_v31 = vld [vmem:[%s1889_s2] sm:$0xff] }
 0x174   : > { %1351 = vmatprep.subr.mxu1 %v1239_v32  ;;  %1376 = vmatprep.subr.mxu0 %v638_v30  ;;  %v1262_v29 = vld [vmem:[%s1890_s3 + $0x2] ss:$0 sm:$0xff] }
 0x175   : > { %1352 = vmatpush3.msra.mxu1 %v1239_v32  ;;  %1377 = vmatpush3.msra.mxu0 %v638_v30  ;;  %v1245_v32 = vld [vmem:[%s1890_s3 + $0x4] ss:$0 sm:$0xff] }
 0x176   : > { %1353 = vmatprep.subr.mxu1 %v1238_v33  ;;  %1378 = vmatprep.subr.mxu0 %v637_v31 }
 0x177   : > { %1354 = vmatpush3.msra.mxu1 %v1238_v33  ;;  %1379 = vmatpush3.msra.mxu0 %v637_v31 }
 0x178   : > { %1355 = vmatprep.subr.mxu1 %v1237_v53 }
 0x179   : > { %1356 = vmatpush3.msra.mxu1 %v1237_v53 }
 0x17a   : > { %1357 = vmatprep.subr.mxu1 %v1236_v58 }
 0x17b   : > { %1358 = vmatpush3.msra.mxu1 %v1236_v58 }
 0x17c   : > { %1359 = vmatprep.subr.mxu1 %v1235_v59 }
 0x17d   : > { %1360 = vmatpush3.msra.mxu1 %v1235_v59 }
 0x22e   : > { %v1344_v35 = vpop.f32.mrf.mxu1 }
 0x22f   : > { %v1687_v36 = vadd.f32 %v1344_v35, %v1232_v34 }
 0x230   : > { %v467_v37 = vpop.f32.mrf.mxu1 }
 0x231   : > { %v483_v38 = vand.u32 2147483647, %v1687_v36  ;;  %v1690_v39 = vadd.f32 %v1232_v34, %v467_v37  ;;  %v477_v63 = vmax.f32 %v1687_v36, 0.0  ;;  %vm479_vm5 = vcmp.ne.f32.partialorder %v1687_v36, %v1687_v36 }
 0x233   : > { %v485_v40 = vsub.f32 0.0, %v483_v38  ;;  %v482_v41 = vand.u32 2147483647, %v1690_v39  ;;  %v476_v3 = vmax.f32 %v1690_v39, 0.0  ;;  %vm478_vm6 = vcmp.ne.f32.partialorder %v1690_v39, %v1690_v39 }
 0x235   : > { %v488_v42 = vmul.f32 1.442695, %v485_v40  ;;  %v484_v43 = vsub.f32 0.0, %v482_v41 }
 0x237   : > { %1452 = vpow2.f32 %v488_v42  ;;  %v486_v44 = vmul.f32 1.442695, %v484_v43  ;;  %v1246_v43 = vld [vmem:[%s1890_s3] ss:$0 sm:$0xff] }
 0x239   : > { %1454 = vpow2.f32 %v486_v44 }
 0x244   : > { %v1453_v45 = vpop.eup %1452 }
 0x245   : > { %v499_v46 = vadd.f32 1.0, %v1453_v45  ;;  %v502_v49 = vmul.f32 -0.5, %v1453_v45  ;;  %v505_v52 = vand.u32 2147483647, %v1453_v45 }
 0x246   : > { %v1455_v47 = vpop.eup %1454 }
 0x247   : > { %v490_v48 = vadd.f32 1.0, %v1455_v47  ;;  %1456 = vlog2.f32 %v499_v46  ;;  %v493_v50 = vmul.f32 -0.5, %v1455_v47  ;;  %v503_v51 = vadd.f32 1.0, %v502_v49 }
 0x248   : > { %v496_v57 = vand.u32 2147483647, %v1455_v47  ;;  %vm506_vm3 = vcmp.lt.f32.partialorder %v505_v52, 0.0004427343 }
 0x249   : > { %1458 = vlog2.f32 %v490_v48  ;;  %v494_v54 = vadd.f32 1.0, %v493_v50  ;;  %v504_v61 = vmul.f32 %v1453_v45, %v503_v51 }
 0x24a   : > { %vm497_vm4 = vcmp.lt.f32.partialorder %v496_v57, 0.0004427343 }
 0x24b   : > { %v495_v1 = vmul.f32 %v1455_v47, %v494_v54 }
 0x254   : > { %v1457_v55 = vpop.eup %1456 }
 0x255   : > { %v501_v60 = vmul.f32 0.6931472, %v1457_v55 }
 0x256   : > { %v1459_v62 = vpop.eup %1458 }
 0x257   : > { %v492_v0 = vmul.f32 0.6931472, %v1459_v62  ;;  %v507_v2 = vsel %vm506_vm3, %v504_v61, %v501_v60 }
 0x258   : > { %v509_v4 = vadd.f32 %v507_v2, %v477_v63  ;;  %v1254_v2 = vld [vmem:[%s1889_s2 + $0x118] sm:$0xff] }
 0x259   : > { %v498_v5 = vsel %vm497_vm4, %v495_v1, %v492_v0  ;;  %1383 = vmatprep.subr.mxu1 %v1254_v2 }
 0x25a   : > { %v508_v6 = vadd.f32 %v498_v5, %v476_v3  ;;  %v511_v8 = vsel %vm479_vm5, %v1687_v36, %v509_v4  ;;  %v1253_v3 = vld [vmem:[%s1889_s2 + $0x110] sm:$0xff]  ;;  %v1252_v4 = vld [vmem:[%s1889_s2 + $0x108] sm:$0xff]  ;;  %v1251_v5 = vld [vmem:[%s1889_s2 + $0x100] sm:$0xff] }
 0x25b   : > { %v1709_v9 = vadd.f32 0.1, %v511_v8 }
 0x25c   : > { %v510_v10 = vsel %vm478_vm6, %v1690_v39, %v508_v6 }
 0x25d   : > { %v1712_v11 = vadd.f32 0.1, %v510_v10  ;;  %v523_v14 = vmul.f32 %v519_v7, %v1709_v9 }
 0x25f   : > { %v522_v17 = vmul.f32 %v517_v56, %v1712_v11  ;;  %528 = vrot.lane.b32.xlu1 %v523_v14, %s1529_s26 }
 0x261   : > { %526 = vrot.lane.b32.xlu0 %v522_v17, %s1529_s26 }
 0x2d1   : > { %v529_v18 = vpop.permute.xlu1 %528 }
 0x2d2   : > { %v1719_v19 = vadd.f32 %v529_v18, %v1687_v36 }
 0x2d3   : > { %v527_v20 = vpop.permute.xlu0 %526 }
 0x2d4   : > { %v1722_v21 = vadd.f32 %v527_v20, %v1690_v39  ;;  %v535_v23 = vsel %vm282_vm1, %v1719_v19, %v1640_v15 }
 0x2d6   : > { %v534_v22 = vsel %vm282_vm1, %v1722_v21, %v1631_v12 }
 0x2d7   : > { %1361 = vmatprep.mubr.msk.f32.mxu1 %vm294_vm2, %v534_v22 }
 0x2d8   : > { %1362 = vmatmul.mubr.msk.f32.vlgmr.msra.gmra.mxu1 %vm294_vm2, %v535_v23 }
 0x2d9   : > { %1384 = vmatpush3.msra.mxu1 %v1254_v2 }
 0x2da   : > { %1385 = vmatprep.subr.mxu1 %v1253_v3 }
 0x2db   : > { %1386 = vmatpush3.msra.mxu1 %v1253_v3 }
 0x2dc   : > { %1387 = vmatprep.subr.mxu1 %v1252_v4 }
 0x2dd   : > { %1388 = vmatpush3.msra.mxu1 %v1252_v4 }
 0x2de   : > { %1389 = vmatprep.subr.mxu1 %v1251_v5 }
 0x2df   : > { %1390 = vmatpush3.msra.mxu1 %v1251_v5 }
 0x398   : > { %v1363_v33 = vpop.f32.mrf.mxu1 }
 0x399   : > { %v632_v34 = vadd.f32 %v1363_v33, %v1245_v32 }
 0x39a   : > { %v617_v35 = vpop.f32.mrf.mxu1 }
 0x39b   : > { %v631_v37 = vadd.f32 %v1245_v32, %v617_v35  ;;  %1460 = vtanh.f32 %v632_v34 }
 0x39d   : > { %1462 = vtanh.f32 %v631_v37 }
 0x3a8   : > { %v1461_v38 = vpop.eup %1460 }
 0x3a9   : > { %v636_v42 = vsel %vm282_vm1, %v1461_v38, %v1642_v16 }
 0x3aa   : > { %v1463_v40 = vpop.eup %1462 }
 0x3ab   : > { %v635_v41 = vsel %vm282_vm1, %v1463_v40, %v1633_v13 }
 0x3ac   : > { %1380 = vmatprep.mubr.msk.f32.mxu0 %vm294_vm2, %v635_v41 }
 0x3ad   : > { %1381 = vmatmul.mubr.msk.f32.vlgmr.msra.gmra.mxu0 %vm294_vm2, %v636_v42 }
 0x46d   : > { %v1382_v44 = vpop.f32.mrf.mxu0 }
 0x46e   : > { %v728_v45 = vadd.f32 %v1382_v44, %v1246_v43 }
 0x46f   : > { %v722_v46 = vpop.f32.mrf.mxu0 }
 0x470   : > { %v723_v47 = vadd.f32 %v1246_v43, %v722_v46  ;;  %747 = vrot.lane.b32.xlu1 %v728_v45, %s1528_s22  ;;  %v1250_v48 = vmul.f32 -1.442695, %v728_v45 }
 0x472   : > { %745 = vrot.lane.b32.xlu0 %v723_v47, %s1528_s22  ;;  %v1249_v49 = vmul.f32 -1.442695, %v723_v47  ;;  %1464 = vpow2.f32 %v1250_v48 }
 0x474   : > { %1466 = vpow2.f32 %v1249_v49 }
 0x47f   : > { %v1465_v50 = vpop.eup %1464 }
 0x480   : > { %v738_v52 = vadd.f32 1.0, %v1465_v50 }
 0x481   : > { %v1467_v51 = vpop.eup %1466 }
 0x482   : > { %v737_v53 = vadd.f32 1.0, %v1467_v51  ;;  %1468 = vrcp.f32 %v738_v52 }
 0x484   : > { %1470 = vrcp.f32 %v737_v53 }
 0x48f   : > { %v1469_v54 = vpop.eup %1468 }
 0x490   : > { %v766_v6 = vsub.f32 1.0, %v1469_v54  ;;  %v778_v8 = vmul.f32 %v1469_v54, %v1642_v16  ;;  %v1260_v16 = vld [vmem:[%s1889_s2 + $0x150] sm:$0xff] }
 0x491   : > { %v1471_v57 = vpop.eup %1470 }
 0x492   : > { %v765_v14 = vsub.f32 1.0, %v1471_v57  ;;  %v777_v20 = vmul.f32 %v1471_v57, %v1633_v13 }
 0x4e2   : > { %v748_v55 = vpop.permute.xlu1 %747 }
 0x4e3   : > { %v752_v56 = vmul.f32 %v1469_v54, %v748_v55 }
 0x4e4   : > { %v746_v58 = vpop.permute.xlu0 %745 }
 0x4e5   : > { %v751_v59 = vmul.f32 %v1471_v57, %v746_v58  ;;  %757 = vrot.lane.b32.xlu1 %v752_v56, %s1530_s5 }
 0x4e7   : > { %755 = vrot.lane.b32.xlu0 %v751_v59, %s1530_s5 }
 0x557   : > { %v758_v60 = vpop.permute.xlu1 %757 }
 0x558   : > { %v762_v61 = vadd.f32 %v758_v60, %v728_v45 }
 0x559   : > { %v756_v62 = vpop.permute.xlu0 %755 }
 0x55a   : > { %1472 = vtanh.f32 %v762_v61  ;;  %v761_v63 = vadd.f32 %v756_v62, %v723_v47 }
 0x55c   : > { %1474 = vtanh.f32 %v761_v63 }
 0x567   : > { %v1473_v0 = vpop.eup %1472 }
 0x568   : > { %771 = vrot.lane.b32.xlu1 %v1473_v0, %s1529_s26 }
 0x569   : > { %v1475_v1 = vpop.eup %1474 }
 0x56a   : > { %769 = vrot.lane.b32.xlu0 %v1475_v1, %s1529_s26 }
 0x5da   : > { %v772_v7 = vpop.permute.xlu1 %771 }
 0x5db   : > { %v776_v10 = vmul.f32 %v772_v7, %v766_v6 }
 0x5dc   : > { %v770_v17 = vpop.permute.xlu0 %769 }
 0x5dd   : > { %v780_v18 = vadd.f32 %v778_v8, %v776_v10  ;;  %v775_v22 = vmul.f32 %v770_v17, %v765_v14 }
 0x5df   : > { %v779_v23 = vadd.f32 %v777_v20, %v775_v22  ;;  %790 = vrot.lane.b32.xlu1 %v780_v18, %s1529_s26 }
 0x5e1   : > { %788 = vrot.lane.b32.xlu0 %v779_v23, %s1529_s26 }
 0x5e3   : > { %1011 = vrot.lane.b32.xlu1 %v1640_v15, %s1530_s5  ;;  %v1261_v15 = vld [vmem:[%s1889_s2 + $0x158] sm:$0xff] }
 0x5e4   : > { %1394 = vmatprep.subr.mxu0 %v1261_v15 }
 0x5e5   : > { %1009 = vrot.lane.b32.xlu0 %v1631_v12, %s1530_s5  ;;  %1395 = vmatpush3.msra.mxu0 %v1261_v15 }
 0x5e6   : > { %1396 = vmatprep.subr.mxu0 %v1260_v16 }
 0x5e7   : > { %1035 = vrot.lane.b32.xlu1 %v1719_v19, %s1528_s22  ;;  %1397 = vmatpush3.msra.mxu0 %v1260_v16  ;;  %v1257_v19 = vld [vmem:[%s1890_s3 + $0x5] ss:$0 sm:$0xff] }
 0x5e9   : > { %1033 = vrot.lane.b32.xlu0 %v1722_v21, %s1528_s22 }
 0x5eb   : > { %1057 = vrot.lane.b32.xlu1 %v1709_v9, %s1529_s26  ;;  %v1259_v9 = vld [vmem:[%s1889_s2 + $0x148] sm:$0xff] }
 0x5ec   : > { %1398 = vmatprep.subr.mxu0 %v1259_v9 }
 0x5ed   : > { %1055 = vrot.lane.b32.xlu0 %v1712_v11, %s1529_s26  ;;  %v1258_v11 = vld [vmem:[%s1889_s2 + $0x140] sm:$0xff]  ;;  %1399 = vmatpush3.msra.mxu0 %v1259_v9 }
 0x5ee   : > { %1400 = vmatprep.subr.mxu0 %v1258_v11 }
 0x5ef   : > { %1041 = vrot.lane.b32.xlu1 %v780_v18, %s1528_s22  ;;  %1401 = vmatpush3.msra.mxu0 %v1258_v11 }
 0x5f1   : > { %1039 = vrot.lane.b32.xlu0 %v779_v23, %s1528_s22 }
 0x651   : > { %v791_v13 = vpop.permute.xlu1 %790 }
 0x652   : > { %1030 = vst.msk [vmem:[#allocation2 + $0x8] sm:$0xff] %vm282_vm1, %v791_v13 }
 0x653   : > { %v789_v12 = vpop.permute.xlu0 %788 }
 0x654   : > { %1029 = vst.msk [vmem:[#allocation2] sm:$0xff] %vm282_vm1, %v789_v12  ;;  %1391 = vmatprep.mubr.msk.f32.mxu1 %vm282_vm1, %v789_v12 }
 0x655   : > { %1392 = vmatmul.mubr.msk.f32.vlgmr.msra.gmra.mxu1 %vm282_vm1, %v791_v13  ;;  %v1012_v4 = vpop.permute.xlu1 %1011 }
 0x657   : > { %v1010_v6 = vpop.permute.xlu0 %1009 }
 0x659   : > { %v1036_v8 = vpop.permute.xlu1 %1035 }
 0x65b   : > { %v1034_v10 = vpop.permute.xlu0 %1033 }
 0x65d   : > { %v1058_v14 = vpop.permute.xlu1 %1057 }
 0x65f   : > { %v1056_v17 = vpop.permute.xlu0 %1055 }
 0x661   : > { %v1042_v18 = vpop.permute.xlu1 %1041 }
 0x663   : > { %v1040_v20 = vpop.permute.xlu0 %1039 }
 0x715   : > { %v1393_v21 = vpop.f32.mrf.mxu1 }
 0x716   : > { %v877_v24 = vadd.f32 %v1393_v21, %v1257_v19 }
 0x717   : > { %v862_v25 = vpop.f32.mrf.mxu1 }
 0x718   : > { %v876_v26 = vadd.f32 %v1257_v19, %v862_v25 }
 0x71a   : > { %1476 = vtanh.f32 %v876_v26 }
 0x71b   : > { %1478 = vtanh.f32 %v877_v24 }
 0x727   : > { %v1477_v27 = vpop.eup %1476 }
 0x728   : > { %v1479_v28 = vpop.eup %1478  ;;  %1402 = vmatprep.mubr.msk.f32.mxu0 %vm282_vm1, %v1477_v27 }
 0x729   : > { %1403 = vmatmul.mubr.msk.f32.vlgmr.msra.gmra.mxu0 %vm282_vm1, %v1479_v28 }
 0x7e9   : > { %v1404_v30 = vpop.f32.mrf.mxu0 }
 0x7ea   : > { %v1828_v31 = vadd.f32 %v1404_v30, %v1262_v29 }
 0x7eb   : > { %v962_v32 = vpop.f32.mrf.mxu0 }
 0x7ec   : > { %v978_v33 = vand.u32 2147483647, %v1828_v31  ;;  %v1831_v34 = vadd.f32 %v1262_v29, %v962_v32  ;;  %1065 = vrot.lane.b32.xlu1 %v1828_v31, %s1528_s22  ;;  %v972_v56 = vmax.f32 %v1828_v31, 0.0  ;;  %vm974_vm9 = vcmp.ne.f32.partialorder %v1828_v31, %v1828_v31 }
 0x7ee   : > { %v980_v35 = vsub.f32 0.0, %v978_v33  ;;  %v977_v37 = vand.u32 2147483647, %v1831_v34  ;;  %1063 = vrot.lane.b32.xlu0 %v1831_v34, %s1528_s22  ;;  %v971_v61 = vmax.f32 %v1831_v34, 0.0  ;;  %vm973_vm10 = vcmp.ne.f32.partialorder %v1831_v34, %v1831_v34 }
 0x7f0   : > { %v983_v38 = vmul.f32 1.442695, %v980_v35  ;;  %v979_v40 = vsub.f32 0.0, %v977_v37 }
 0x7f2   : > { %1480 = vpow2.f32 %v983_v38  ;;  %v981_v41 = vmul.f32 1.442695, %v979_v40 }
 0x7f4   : > { %1482 = vpow2.f32 %v981_v41 }
 0x7ff   : > { %v1481_v42 = vpop.eup %1480 }
 0x800   : > { %v994_v43 = vadd.f32 1.0, %v1481_v42  ;;  %v997_v46 = vmul.f32 -0.5, %v1481_v42  ;;  %v1000_v49 = vand.u32 2147483647, %v1481_v42 }
 0x801   : > { %v1483_v44 = vpop.eup %1482 }
 0x802   : > { %1484 = vlog2.f32 %v994_v43  ;;  %v985_v45 = vadd.f32 1.0, %v1483_v44  ;;  %v988_v47 = vmul.f32 -0.5, %v1483_v44  ;;  %v998_v48 = vadd.f32 1.0, %v997_v46 }
 0x803   : > { %v991_v52 = vand.u32 2147483647, %v1483_v44  ;;  %vm1001_vm7 = vcmp.lt.f32.partialorder %v1000_v49, 0.0004427343 }
 0x804   : > { %1486 = vlog2.f32 %v985_v45  ;;  %v989_v50 = vadd.f32 1.0, %v988_v47  ;;  %v999_v54 = vmul.f32 %v1481_v42, %v998_v48 }
 0x805   : > { %vm992_vm8 = vcmp.lt.f32.partialorder %v991_v52, 0.0004427343 }
 0x806   : > { %v990_v59 = vmul.f32 %v1483_v44, %v989_v50 }
 0x80f   : > { %v1485_v51 = vpop.eup %1484 }
 0x810   : > { %v996_v53 = vmul.f32 0.6931472, %v1485_v51 }
 0x811   : > { %v1487_v55 = vpop.eup %1486 }
 0x812   : > { %v1002_v57 = vsel %vm1001_vm7, %v999_v54, %v996_v53  ;;  %v987_v58 = vmul.f32 0.6931472, %v1487_v55 }
 0x813   : > { %v1004_v60 = vadd.f32 %v1002_v57, %v972_v56 }
 0x814   : > { %v993_v62 = vsel %vm992_vm8, %v990_v59, %v987_v58 }
 0x815   : > { %v1006_v63 = vsel %vm974_vm9, %v1828_v31, %v1004_v60  ;;  %v1003_v0 = vadd.f32 %v993_v62, %v971_v61 }
 0x816   : > { %v1008_v1 = vadd.f32 0.1, %v1006_v63 }
 0x817   : > { %v1005_v2 = vsel %vm973_vm10, %v1831_v34, %v1003_v0 }
 0x818   : > { %1073 = vrot.lane.b32.xlu1 %v1008_v1, %s1528_s22  ;;  %v1007_v3 = vadd.f32 0.1, %v1005_v2  ;;  %v1016_v5 = vmul.f32 %v1012_v4, %v1008_v1 }
 0x81a   : > { %1071 = vrot.lane.b32.xlu0 %v1007_v3, %s1528_s22  ;;  %v1015_v7 = vmul.f32 %v1010_v6, %v1007_v3 }
 0x81c   : > { %1021 = vrot.lane.b32.xlu1 %v1016_v5, %s1529_s26 }
 0x81e   : > { %1019 = vrot.lane.b32.xlu0 %v1015_v7, %s1529_s26 }
 0x820   : > { %1049 = vrot.lane.b32.xlu1 %v1687_v36, %s1529_s26 }
 0x822   : > { %1047 = vrot.lane.b32.xlu0 %v1690_v39, %s1529_s26 }
 0x85e   : > { %v1066_v22 = vpop.permute.xlu1 %1065 }
 0x85f   : > { %v1085_v13 = vsel %vm282_vm1, %v1058_v14, %v1066_v22 }
 0x860   : > { %v1064_v23 = vpop.permute.xlu0 %1063 }
 0x861   : > { %v1084_v36 = vsel %vm282_vm1, %v1056_v17, %v1064_v23 }
 0x88a   : > { %v1074_v12 = vpop.permute.xlu1 %1073 }
 0x88b   : > { %v1087_v15 = vsel %vm294_vm2, %v1085_v13, %v1074_v12 }
 0x88c   : > { %v1089_v39 = vsel %vm1081_vm11, %v1087_v15, 0.0  ;;  %v1072_v16 = vpop.permute.xlu0 %1071 }
 0x88d   : > { %1093 = vst [vmem:[%s1601_s14 + $0x18] sm:$0xff] %v1089_v39  ;;  %v1086_v9 = vsel %vm294_vm2, %v1084_v36, %v1072_v16 }
 0x88e   : > { %v1088_v11 = vsel %vm1081_vm11, %v1086_v9, 0.0  ;;  %v1022_v19 = vpop.permute.xlu1 %1021 }
 0x88f   : > { %1091 = vst [vmem:[%s1601_s14 + $0x8] sm:$0xff] %v1088_v11  ;;  %v1026_v21 = vadd.f32 %v1022_v19, %v1828_v31 }
 0x890   : > { %v1020_v24 = vpop.permute.xlu0 %1019 }
 0x891   : > { %v1078_v25 = vsel %vm282_vm1, %v1026_v21, %v1036_v8  ;;  %v1025_v26 = vadd.f32 %v1020_v24, %v1831_v34 }
 0x892   : > { %v1080_v27 = vsel %vm294_vm2, %v1078_v25, %v1042_v18  ;;  %v1050_v28 = vpop.permute.xlu1 %1049 }
 0x893   : > { %v1077_v29 = vsel %vm282_vm1, %v1025_v26, %v1034_v10  ;;  %v1083_v30 = vsel %vm1081_vm11, %v1080_v27, %v1050_v28 }
 0x894   : > { %1092 = vst [vmem:[%s1601_s14 + $0x10] sm:$0xff] %v1083_v30  ;;  %v1079_v32 = vsel %vm294_vm2, %v1077_v29, %v1040_v20  ;;  %v1048_v33 = vpop.permute.xlu0 %1047 }
 0x895   : > { %v1082_v35 = vsel %vm1081_vm11, %v1079_v32, %v1048_v33 }
 0x896   : > { %1090 = vst [vmem:[%s1601_s14] sm:$0xff] %v1082_v35 }
 0x897 PF: > { %s14_s19 = sadd.s32 1, %s1526_s19   ;;  %s1892_s15 = smov %s1518_s17 }
 0x898   : > { %p11_p8 = scmp.ge.s32.totalorder %s14_s19, 18   ;;  %s1893_s16 = smov %s1522_s18 }
 0x899   : > { %s1894_s17 = smov %s1897_s20  ;;  %s1895_s18 = smov %s1901_s21 }
 0x89a   :  { %13 = sbr.rel (!%p11_p8) target bundleno = 3 (0x3), region = 78 }

</bundles_post_ra>
